<compile_context>
chip_gen: v5e
topology: v5e:2x2
jax: 0.10.0
libtpu: 0.0.40
codegen_flags: <defaults>
</compile_context>

<pallas_src>
import functools

import jax
import jax.numpy as jnp
from jax.experimental import pallas as pl
from jax.experimental.pallas import tpu as pltpu

_LANE = 128
_SUBLANE = 8


def _round_up(a, b):
    return (a + b - 1) // b * b


def _round_down(a, b):
    return (a // b) * b


def _gap_kernel(x_ref, o_ref, acc_ref, *, hw, thw, needs_mask):
    """Row-wise mean over the spatial axis, accumulated across HW tiles.

    x_ref:   (TR, THW) input tile (rows = flattened B*C, cols = spatial chunk)
    o_ref:   (TR, 1)   per-row mean (written only on the last HW step)
    acc_ref: (TR, 1)   f32 running sum, resident across the HW grid axis
    """
    k = pl.program_id(1)

    @pl.when(k == 0)
    def _init():
        acc_ref[...] = jnp.zeros_like(acc_ref)

    x = x_ref[...]
    if needs_mask:
        # Last spatial tile may run past HW; zero out-of-range columns so
        # padded/garbage lanes never enter the partial sum.
        col = jax.lax.broadcasted_iota(jnp.int32, x.shape, 1) + k * thw
        x = jnp.where(col < hw, x, jnp.zeros_like(x))

    # Accumulate in f32 without materializing a full f32 copy of the tile.
    acc_ref[...] += jnp.sum(x, axis=-1, keepdims=True, dtype=jnp.float32)

    @pl.when(k == pl.num_programs(1) - 1)
    def _finalize():
        o_ref[...] = (acc_ref[...] * (1.0 / hw)).astype(o_ref.dtype)


def _choose_tiles(r, hw, itemsize, block_bytes):
    """Pick (row_tile, spatial_tile) so one padded input block fits the budget."""
    # Largest legal row tile not exceeding the row extent: a multiple of 8
    # (sublane tile) or the full dim when R < 8.
    tr_cap = r if r < _SUBLANE else _round_down(r, _SUBLANE)

    # VMEM pads the lane (last) dim to 128 — budget against the padded size.
    padded_row_bytes = _round_up(hw, _LANE) * itemsize

    if _SUBLANE * padded_row_bytes <= block_bytes:
        # Whole rows fit: take as many rows per block as the budget allows.
        tr = min(tr_cap,
                 max(_SUBLANE, _round_down(block_bytes // padded_row_bytes, _SUBLANE)))
        thw = hw                      # full spatial extent -> no masking needed
    else:
        # Large images: tile the spatial axis in lane-aligned chunks.
        tr = min(tr_cap, _SUBLANE)
        thw = max(_LANE, _round_down(block_bytes // (_SUBLANE * itemsize), _LANE))
        if thw >= hw:
            thw = hw
    return tr, thw


def fast_global_avg_pool(x, flatten=False, *, block_bytes=2 * 1024 * 1024):
    """x: (B, C, H, W). Returns (B, C) if flatten else (B, C, 1, 1)."""
    B, C, H, W = x.shape
    R = B * C
    HW = H * W
    x2 = x.reshape(R, HW)

    itemsize = jnp.dtype(x.dtype).itemsize
    tr, thw = _choose_tiles(R, HW, itemsize, block_bytes)
    grid = (pl.cdiv(R, tr), pl.cdiv(HW, thw))
    needs_mask = (HW % thw) != 0

    kernel = functools.partial(_gap_kernel, hw=HW, thw=thw, needs_mask=needs_mask)

    # VMEM budget: 2x double-buffered input block + output block + f32 scratch
    # (all lane/sublane padded) + slack. Floor at 16 MiB (<= every generation's
    # scoped default), cap below v7x's 64 MiB physical VMEM.
    padded_in = _round_up(tr, _SUBLANE) * _round_up(thw, _LANE) * itemsize
    padded_col = _round_up(tr, _SUBLANE) * _LANE * 4
    vmem_limit = 2 * padded_in + 3 * padded_col + (2 << 20)
    vmem_limit = int(min(max(vmem_limit, 16 * 1024 * 1024), 60 * 1024 * 1024))

    out = pl.pallas_call(
        kernel,
        out_shape=jax.ShapeDtypeStruct((R, 1), x.dtype),
        grid_spec=pltpu.PrefetchScalarGridSpec(
            num_scalar_prefetch=0,
            grid=grid,
            in_specs=[pl.BlockSpec((tr, thw), lambda r, k: (r, k))],
            out_specs=pl.BlockSpec((tr, 1), lambda r, k: (r, 0)),
            scratch_shapes=[pltpu.VMEM((tr, 1), jnp.float32)],
        ),
        compiler_params=pltpu.CompilerParams(
            dimension_semantics=("parallel", "arbitrary"),
            vmem_limit_bytes=vmem_limit,
        ),
    )(x2)

    pooled = out.reshape(B, C)
    if flatten:
        return pooled
    return pooled.reshape(B, C, 1, 1)


if __name__ == "__main__":
    key = jax.random.PRNGKey(0)

    # Small shapes matching the module's expected NCHW input.
    B, C, H, W = 2, 4, 16, 16
    x = jax.random.normal(key, (B, C, H, W), dtype=jnp.float32)
    ref = jnp.mean(x.reshape(B, C, -1), axis=-1)

    # flatten=False path (default of the torch module)
    y = fast_global_avg_pool(x, flatten=False)
    y = jax.block_until_ready(y)
    assert y.shape == (B, C, 1, 1), y.shape
    assert jnp.allclose(y.reshape(B, C), ref, atol=1e-5, rtol=1e-5)

    # flatten=True path
    y_flat = fast_global_avg_pool(x, flatten=True)
    y_flat = jax.block_until_ready(y_flat)
    assert y_flat.shape == (B, C), y_flat.shape
    assert jnp.allclose(y_flat, ref, atol=1e-5, rtol=1e-5)

    # Exercise the tiled-HW + remainder-mask path: tiny block budget and a
    # spatial size (15*20 = 300) that is not a multiple of the 128-lane tile.
    Hm, Wm = 15, 20
    xm = jax.random.normal(jax.random.PRNGKey(1), (B, C, Hm, Wm), dtype=jnp.float32)
    ym = fast_global_avg_pool(xm, flatten=True, block_bytes=4096)
    ym = jax.block_until_ready(ym)
    refm = jnp.mean(xm.reshape(B, C, -1), axis=-1)
    assert jnp.allclose(ym, refm, atol=1e-5, rtol=1e-5)

    # bf16 input: accumulate in f32, emit bf16.
    xb = x.astype(jnp.bfloat16)
    yb = fast_global_avg_pool(xb, flatten=True)
    yb = jax.block_until_ready(yb)
    refb = jnp.mean(xb.astype(jnp.float32).reshape(B, C, -1), axis=-1)
    assert jnp.allclose(yb.astype(jnp.float32), refb, atol=2e-2, rtol=2e-2)

    print("KERNEL_OK")
</pallas_src>

<mosaic_0001>
module attributes {stable_mosaic.version = 11 : i64} {
  func.func @_gap_kernel(%arg0: i32, %arg1: i32, %arg2: memref<8x256xf32, #tpu.memory_space<vmem>>, %arg3: memref<8x1xf32, #tpu.memory_space<vmem>>, %arg4: memref<8x1xf32, #tpu.memory_space<vmem>>) attributes {dimension_semantics = [#tpu.dimension_semantics<parallel>, #tpu.dimension_semantics<arbitrary>], iteration_bounds = array<i64: 1, 1>, scalar_prefetch = 0 : i64, scratch_operands = 1 : i64, tpu.core_type = #tpu.core_type<tc>, window_params = [{transform_indices = @transform_0, window_bounds = array<i64: 8, 256>}, {transform_indices = @transform_1, window_bounds = array<i64: 8, 1>}]} {
    %c0_i32 = arith.constant 0 : i32
    %0 = arith.cmpi eq, %arg1, %c0_i32 : i32
    %1 = arith.extui %0 : i1 to i32
    %c0_i32_0 = arith.constant 0 : i32
    %2 = arith.cmpi ne, %1, %c0_i32_0 : i32
    scf.if %2 {
      %cst_8 = arith.constant 0.000000e+00 : f32
      %12 = vector.broadcast %cst_8 : f32 to vector<8x1xf32>
      %c0_9 = arith.constant 0 : index
      %c0_10 = arith.constant 0 : index
      %13 = vector.load %arg4[%c0_9, %c0_10] : memref<8x1xf32, #tpu.memory_space<vmem>>, vector<8x1xf32>
      tpu.vector_store %arg4[%c0_9, %c0_10], %12 {strides = array<i32>} : memref<8x1xf32, #tpu.memory_space<vmem>>, vector<8x1xf32>,
    } else {
    }
    %c0 = arith.constant 0 : index
    %c0_1 = arith.constant 0 : index
    %3 = vector.load %arg2[%c0, %c0_1] : memref<8x256xf32, #tpu.memory_space<vmem>>, vector<8x256xf32>
    %c0_2 = arith.constant 0 : index
    %c0_3 = arith.constant 0 : index
    %4 = vector.load %arg4[%c0_2, %c0_3] : memref<8x1xf32, #tpu.memory_space<vmem>>, vector<8x1xf32>
    %cst = arith.constant dense<0.000000e+00> : vector<8xf32>
    %5 = vector.multi_reduction <add>, %3, %cst [1] : vector<8x256xf32> to vector<8xf32>
    %6 = vector.shape_cast %5 : vector<8xf32> to vector<8x1xf32>
    %7 = arith.addf %4, %6 : vector<8x1xf32>
    %c0_4 = arith.constant 0 : index
    %c0_5 = arith.constant 0 : index
    %8 = vector.load %arg4[%c0_4, %c0_5] : memref<8x1xf32, #tpu.memory_space<vmem>>, vector<8x1xf32>
    tpu.vector_store %arg4[%c0_4, %c0_5], %7 {strides = array<i32>} : memref<8x1xf32, #tpu.memory_space<vmem>>, vector<8x1xf32>,
    %c0_i32_6 = arith.constant 0 : i32
    %9 = arith.cmpi eq, %arg1, %c0_i32_6 : i32
    %10 = arith.extui %9 : i1 to i32
    %c0_i32_7 = arith.constant 0 : i32
    %11 = arith.cmpi ne, %10, %c0_i32_7 : i32
    scf.if %11 {
      %c0_8 = arith.constant 0 : index
      %c0_9 = arith.constant 0 : index
      %12 = vector.load %arg4[%c0_8, %c0_9] : memref<8x1xf32, #tpu.memory_space<vmem>>, vector<8x1xf32>
      %cst_10 = arith.constant 3.906250e-03 : f32
      %13 = vector.broadcast %cst_10 : f32 to vector<8x1xf32>
      %14 = arith.mulf %12, %13 : vector<8x1xf32>
      %c0_11 = arith.constant 0 : index
      %c0_12 = arith.constant 0 : index
      %15 = vector.load %arg3[%c0_11, %c0_12] : memref<8x1xf32, #tpu.memory_space<vmem>>, vector<8x1xf32>
      tpu.vector_store %arg3[%c0_11, %c0_12], %14 {strides = array<i32>} : memref<8x1xf32, #tpu.memory_space<vmem>>, vector<8x1xf32>,
    } else {
    }
    return
  }
  func.func @transform_0(%arg0: i32, %arg1: i32) -> (i32, i32) {
    %c0_i32 = arith.constant 0 : i32
    return %arg0, %arg1 : i32, i32
  }
  func.func @transform_1(%arg0: i32, %arg1: i32) -> (i32, i32) {
    %c0_i32 = arith.constant 0 : i32
    %c0_i32_0 = arith.constant 0 : i32
    return %arg0, %c0_i32 : i32, i32
  }
}

</mosaic_0001>

<bundles_post_ra>
// kernel: tpu_custom_call.1
= control target key start
LH: loop header
LB: loop body
LE: loop exit
PB: predicated region body
PF: predicated region fallthrough
CT: control target
= control target key end

     0   :  { %6 = vsyncpa [#allocation4], 0  ;;  %s76_s9 = smov [#allocation3]   ;;  %s94_s0 = inlined_call_operand.hbm [shape: f32[8,256], index: 0, kind: input, shape index: {}]   ;;  %s95_s1 = inlined_call_operand.vmem [shape: f32[8,1], index: 1, kind: output, shape index: {}]  }
   0x1   :  { %s12_s8 = sshll.u32 %s94_s0, 4  ;;  %s14_s10 = sshll.u32 %s76_s9, 4  ;;  %s13_s8 = int_to_ptr.hbm [resolvable:$true] %s12_s8  ;;  %s15_s10 = int_to_ptr.vmem [resolvable:$true] %s14_s10 }
   0x2   :  { %17 = dma.hbm_to_vmem [thread:$0]  %s13_s8, 256, %s15_s10, [#allocation4]  }
   0x3   :  { %74 = dma.done.wait [#allocation4], 256  }
   0x4   :  { %75 = vsyncadd [#allocation4], 4294967040  ;;  %vm26_vm0 = vcmask 7168   ;;  %v77_v0 = vmov 0.0   ;;  %v28_v1 = vld [vmem:[#allocation3] sm:$0xff]  ;;  %v29_v2 = vld [vmem:[#allocation3 + $0x8] sm:$0xff] }
   0x5   :  { %27 = vst.msk [vmem:[#allocation2] sm:$0xff] %vm26_vm0, %v77_v0  ;;  %v31_v3 = vadd.f32 %v29_v2, %v28_v1 }
   0x7   :  { %32 = vadd.xlane.f32.xlu0 %v31_v3 }
   0xc   :  { %v30_v4 = vld [vmem:[#allocation2] sm:$0xff] }
  0x7a   :  { %v33_v5 = vpop.xlane.xlu0 %32 }
  0x7b   :  { %v34_v6 = vadd.f32 %v33_v5, %v30_v4 }
  0x7d   :  { %36 = vst.msk [vmem:[#allocation2] sm:$0xff] %vm26_vm0, %v34_v6 }
  0x84   :  { %v40_v7 = vld [vmem:[#allocation2] sm:$0xff] }
  0x85   :  { %v41_v8 = vmul.f32 0.00390625, %v40_v7 }
  0x87   :  { %42 = vst.msk [vmem:[%s95_s1] sm:$0xff] %vm26_vm0, %v41_v8 }
  0x88   :  { %47 = vsyncpa [#allocation4], 1 }

</bundles_post_ra>
